<compile_context>
chip_gen: v5e
topology: v5e:2x2
jax: 0.10.0
libtpu: 0.0.40
codegen_flags: <defaults>
</compile_context>

<pallas_src>
import jax
import jax.numpy as jnp
from jax.experimental import pallas as pl
from jax.experimental.pallas import tpu as pltpu

_ROW_ALIGN = 16  # sublane alignment safe for both f32 (8) and bf16 (16) inputs


def _cdiv(a, b):
    return -(-a // b)


def _round_up(x, m):
    return _cdiv(x, m) * m


def simpleff_kernel(x_ref, w1_ref, b1_ref, w2_ref, b2_ref, w3_ref, b3_ref, o_ref):
    # bf16 operands on the MXU, f32 accumulation + elementwise (v5e-safe).
    # astype is a no-op if the caller already supplies bf16 activations.
    x = x_ref[...].astype(jnp.bfloat16)

    # fl1 + ReLU
    h1 = jnp.dot(x, w1_ref[...], preferred_element_type=jnp.float32) + b1_ref[...]
    h1 = jnp.maximum(h1, 0.0)

    # fl2 + ReLU
    h2 = jnp.dot(h1.astype(jnp.bfloat16), w2_ref[...],
                 preferred_element_type=jnp.float32) + b2_ref[...]
    h2 = jnp.maximum(h2, 0.0)

    # fl3 (narrow output width == out_size; no lane padding)
    logits = jnp.dot(h2.astype(jnp.bfloat16), w3_ref[...],
                     preferred_element_type=jnp.float32) + b3_ref[...]

    # LogSoftmax(dim=1), numerically stable max-shifted form, all in f32.
    m = jnp.max(logits, axis=1, keepdims=True)
    shifted = logits - m
    lse = jnp.log(jnp.sum(jnp.exp(shifted), axis=1, keepdims=True))
    o_ref[...] = (shifted - lse).astype(o_ref.dtype)


def _choose_batch_tile(B, batch_tile):
    # Tiny batches: one fused step.
    if B <= 2 * _ROW_ALIGN:
        return _round_up(B, _ROW_ALIGN)
    # Medium batches: force exactly 2 grid steps so "parallel" actually uses
    # both TensorCores on v7x and the tail tile stays balanced.
    if B < 2 * batch_tile:
        return _round_up(_cdiv(B, 2), _ROW_ALIGN)
    return batch_tile


def _vmem_limit_bytes(tb, in_size, h1, h2, out_size, x_itemsize):
    x_stream = 2 * tb * in_size * x_itemsize          # double-buffered input tiles
    o_stream = 2 * tb * out_size * 4                  # double-buffered output tiles
    params = 2 * ((in_size * h1 + h1 * h2 + h2 * out_size) * 2
                  + (h1 + h2 + out_size) * 4)
    acts = 2 * tb * (h1 + h2 + 2 * out_size) * 4      # f32 h1/h2/logits/exp temps
    est = x_stream + o_stream + params + acts
    # 1.5x margin + 4 MiB slack, clamped to [16 MiB, 64 MiB] (v7x physical/TC).
    return int(min(max(est * 3 // 2 + (4 << 20), 16 << 20), 64 << 20))


def simpleff_forward(x, packed, *, batch_tile=4096):
    """x: (B, input_size), f32 or bf16 (bf16 halves the input HBM stream).
    packed: output of pack_params()."""
    w1, b1 = packed["w1"], packed["b1"]
    w2, b2 = packed["w2"], packed["b2"]
    w3, b3 = packed["w3"], packed["b3"]

    B, in_size = x.shape
    h1_size, h2_size = w1.shape[1], w2.shape[1]
    out_size = w3.shape[1]

    # No jnp.pad of x and no post-kernel slice: grid covers cdiv(B, tb) tiles and
    # the ragged final tile gets masked output stores automatically.
    tb = _choose_batch_tile(B, batch_tile)
    grid = (_cdiv(B, tb),)

    x_itemsize = jnp.dtype(x.dtype).itemsize
    param_bytes = sum(int(a.size) * jnp.dtype(a.dtype).itemsize
                      for a in (w1, b1, w2, b2, w3, b3))
    cost = pl.CostEstimate(
        flops=2 * B * (in_size * h1_size + h1_size * h2_size + h2_size * out_size),
        transcendentals=B * (out_size + 1),
        bytes_accessed=B * in_size * x_itemsize + B * out_size * 4 + param_bytes,
    )

    # Weights / biases: full blocks with a constant index_map -> DMA'd once,
    # VMEM-resident for every grid step. Only x and out stream through HBM.
    resident = lambda a: pl.BlockSpec(a.shape, lambda i: (0, 0))

    return pl.pallas_call(
        simpleff_kernel,
        out_shape=jax.ShapeDtypeStruct((B, out_size), jnp.float32),
        grid=grid,
        in_specs=[
            pl.BlockSpec((tb, in_size), lambda i: (i, 0)),
            resident(w1), resident(b1),
            resident(w2), resident(b2),
            resident(w3), resident(b3),
        ],
        out_specs=pl.BlockSpec((tb, out_size), lambda i: (i, 0)),
        compiler_params=pltpu.CompilerParams(
            dimension_semantics=("parallel",),
            vmem_limit_bytes=_vmem_limit_bytes(
                tb, in_size, h1_size, h2_size, out_size, x_itemsize),
        ),
        cost_estimate=cost,
    )(x, w1, b1, w2, b2, w3, b3)


def init_params(key, input_size, hidden1, hidden2, output_size):
    """Logical (f32) params, mimicking torch.nn.Linear's uniform fan-in init.
    Weights stored already transposed: (in_features, out_features); biases (1, out)."""
    ks = jax.random.split(key, 6)

    def lin(kw, kb, fan_in, fan_out):
        bound = 1.0 / jnp.sqrt(fan_in)
        w = jax.random.uniform(kw, (fan_in, fan_out), jnp.float32, -bound, bound)
        b = jax.random.uniform(kb, (1, fan_out), jnp.float32, -bound, bound)
        return w, b

    w1, b1 = lin(ks[0], ks[1], input_size, hidden1)
    w2, b2 = lin(ks[2], ks[3], hidden1, hidden2)
    w3, b3 = lin(ks[4], ks[5], hidden2, output_size)
    return {"w1": w1, "b1": b1, "w2": w2, "b2": b2, "w3": w3, "b3": b3}


def pack_params(params):
    """Kernel-ready params: bf16 weights (MXU operands), f32 biases. No padding."""
    return {
        "w1": params["w1"].astype(jnp.bfloat16),
        "b1": params["b1"].astype(jnp.float32),
        "w2": params["w2"].astype(jnp.bfloat16),
        "b2": params["b2"].astype(jnp.float32),
        "w3": params["w3"].astype(jnp.bfloat16),
        "b3": params["b3"].astype(jnp.float32),
    }


def reference_forward(x, params):
    """Pure-JAX reference mirroring the kernel's bf16-operand / f32-accumulate math."""
    def lin(h, w, b):
        return jnp.dot(h.astype(jnp.bfloat16), w.astype(jnp.bfloat16),
                       preferred_element_type=jnp.float32) + b

    h1 = jnp.maximum(lin(x, params["w1"], params["b1"]), 0.0)
    h2 = jnp.maximum(lin(h1, params["w2"], params["b2"]), 0.0)
    logits = lin(h2, params["w3"], params["b3"])
    return jax.nn.log_softmax(logits, axis=1)


if __name__ == "__main__":
    key = jax.random.PRNGKey(0)
    k_x, k_x2, k_p = jax.random.split(key, 3)

    batch, input_size, hidden1, hidden2, output_size = 8, 32, 64, 32, 16

    params = init_params(k_p, input_size, hidden1, hidden2, output_size)
    packed = pack_params(params)

    # Small batch: single fused grid step.
    x = jax.random.normal(k_x, (batch, input_size), dtype=jnp.float32)
    out = jax.block_until_ready(simpleff_forward(x, packed))
    ref = reference_forward(x, params)
    assert out.shape == (batch, output_size)
    assert jnp.allclose(out, ref, atol=1e-2, rtol=1e-2), "mismatch (small batch)"

    # Non-aligned larger batch with a small tile: cdiv grid (3 steps) exercising
    # the ragged final tile / masked stores (no jnp.pad, no output slice).
    x2 = jax.random.normal(k_x2, (300, input_size), dtype=jnp.float32)
    out2 = jax.block_until_ready(simpleff_forward(x2, packed, batch_tile=128))
    ref2 = reference_forward(x2, params)
    assert out2.shape == (300, output_size)
    assert jnp.allclose(out2, ref2, atol=1e-2, rtol=1e-2), "mismatch (tiled f32)"

    # bf16-input fast path (input cast here only to exercise it; real callers
    # should hold x in bf16 already). Default batch_tile -> exactly 2 grid steps.
    out3 = jax.block_until_ready(simpleff_forward(x2.astype(jnp.bfloat16), packed))
    assert out3.shape == (300, output_size)
    assert jnp.allclose(out3, ref2, atol=1e-2, rtol=1e-2), "mismatch (bf16 input)"

    print("KERNEL_OK")
</pallas_src>

<mosaic_0001>
module attributes {stable_mosaic.version = 11 : i64} {
  func.func @simpleff_kernel(%arg0: i32, %arg1: memref<16x32xf32, #tpu.memory_space<vmem>>, %arg2: memref<32x64xbf16, #tpu.memory_space<vmem>>, %arg3: memref<1x64xf32, #tpu.memory_space<vmem>>, %arg4: memref<64x32xbf16, #tpu.memory_space<vmem>>, %arg5: memref<1x32xf32, #tpu.memory_space<vmem>>, %arg6: memref<32x16xbf16, #tpu.memory_space<vmem>>, %arg7: memref<1x16xf32, #tpu.memory_space<vmem>>, %arg8: memref<16x16xf32, #tpu.memory_space<vmem>>) attributes {dimension_semantics = [#tpu.dimension_semantics<parallel>], iteration_bounds = array<i64: 1>, scalar_prefetch = 0 : i64, scratch_operands = 0 : i64, tpu.core_type = #tpu.core_type<tc>, window_params = [{transform_indices = @transform_0, window_bounds = array<i64: 16, 32>}, {pipeline_mode = #tpu.pipeline_mode<synchronous>, transform_indices = @transform_1, window_bounds = array<i64: 32, 64>}, {pipeline_mode = #tpu.pipeline_mode<synchronous>, transform_indices = @transform_2, window_bounds = array<i64: 1, 64>}, {pipeline_mode = #tpu.pipeline_mode<synchronous>, transform_indices = @transform_3, window_bounds = array<i64: 64, 32>}, {pipeline_mode = #tpu.pipeline_mode<synchronous>, transform_indices = @transform_4, window_bounds = array<i64: 1, 32>}, {pipeline_mode = #tpu.pipeline_mode<synchronous>, transform_indices = @transform_5, window_bounds = array<i64: 32, 16>}, {pipeline_mode = #tpu.pipeline_mode<synchronous>, transform_indices = @transform_6, window_bounds = array<i64: 1, 16>}, {transform_indices = @transform_7, window_bounds = array<i64: 16, 16>}]} {
    %c0 = arith.constant 0 : index
    %c0_0 = arith.constant 0 : index
    %0 = vector.load %arg1[%c0, %c0_0] : memref<16x32xf32, #tpu.memory_space<vmem>>, vector<16x32xf32>
    %1 = arith.truncf %0 : vector<16x32xf32> to vector<16x32xbf16>
    %c0_1 = arith.constant 0 : index
    %c0_2 = arith.constant 0 : index
    %2 = vector.load %arg2[%c0_1, %c0_2] : memref<32x64xbf16, #tpu.memory_space<vmem>>, vector<32x64xbf16>
    %cst = arith.constant dense<0.000000e+00> : vector<16x64xf32>
    %3 = tpu.matmul %1, %2, %cst {dimension_numbers = #tpu.dot_dimension_numbers<[1], [0], [0], [1], [0, 0, 1, 1], [], []>} : vector<16x32xbf16>, vector<32x64xbf16>, vector<16x64xf32> -> vector<16x64xf32>
    %c0_3 = arith.constant 0 : index
    %c0_4 = arith.constant 0 : index
    %4 = vector.load %arg3[%c0_3, %c0_4] : memref<1x64xf32, #tpu.memory_space<vmem>>, vector<1x64xf32>
    %5 = vector.broadcast %4 : vector<1x64xf32> to vector<16x64xf32>
    %6 = arith.addf %3, %5 : vector<16x64xf32>
    %cst_5 = arith.constant 0.000000e+00 : f32
    %7 = vector.broadcast %cst_5 : f32 to vector<16x64xf32>
    %8 = arith.maximumf %6, %7 : vector<16x64xf32>
    %9 = arith.truncf %8 : vector<16x64xf32> to vector<16x64xbf16>
    %c0_6 = arith.constant 0 : index
    %c0_7 = arith.constant 0 : index
    %10 = vector.load %arg4[%c0_6, %c0_7] : memref<64x32xbf16, #tpu.memory_space<vmem>>, vector<64x32xbf16>
    %cst_8 = arith.constant dense<0.000000e+00> : vector<16x32xf32>
    %11 = tpu.matmul %9, %10, %cst_8 {dimension_numbers = #tpu.dot_dimension_numbers<[1], [0], [0], [1], [0, 0, 1, 1], [], []>} : vector<16x64xbf16>, vector<64x32xbf16>, vector<16x32xf32> -> vector<16x32xf32>
    %c0_9 = arith.constant 0 : index
    %c0_10 = arith.constant 0 : index
    %12 = vector.load %arg5[%c0_9, %c0_10] : memref<1x32xf32, #tpu.memory_space<vmem>>, vector<1x32xf32>
    %13 = vector.broadcast %12 : vector<1x32xf32> to vector<16x32xf32>
    %14 = arith.addf %11, %13 : vector<16x32xf32>
    %cst_11 = arith.constant 0.000000e+00 : f32
    %15 = vector.broadcast %cst_11 : f32 to vector<16x32xf32>
    %16 = arith.maximumf %14, %15 : vector<16x32xf32>
    %17 = arith.truncf %16 : vector<16x32xf32> to vector<16x32xbf16>
    %c0_12 = arith.constant 0 : index
    %c0_13 = arith.constant 0 : index
    %18 = vector.load %arg6[%c0_12, %c0_13] : memref<32x16xbf16, #tpu.memory_space<vmem>>, vector<32x16xbf16>
    %cst_14 = arith.constant dense<0.000000e+00> : vector<16x16xf32>
    %19 = tpu.matmul %17, %18, %cst_14 {dimension_numbers = #tpu.dot_dimension_numbers<[1], [0], [0], [1], [0, 0, 1, 1], [], []>} : vector<16x32xbf16>, vector<32x16xbf16>, vector<16x16xf32> -> vector<16x16xf32>
    %c0_15 = arith.constant 0 : index
    %c0_16 = arith.constant 0 : index
    %20 = vector.load %arg7[%c0_15, %c0_16] : memref<1x16xf32, #tpu.memory_space<vmem>>, vector<1x16xf32>
    %21 = vector.broadcast %20 : vector<1x16xf32> to vector<16x16xf32>
    %22 = arith.addf %19, %21 : vector<16x16xf32>
    %cst_17 = arith.constant dense<0xFF800000> : vector<16xf32>
    %23 = vector.multi_reduction <maximumf>, %22, %cst_17 [1] : vector<16x16xf32> to vector<16xf32>
    %24 = vector.shape_cast %23 : vector<16xf32> to vector<16x1xf32>
    %25 = vector.broadcast %24 : vector<16x1xf32> to vector<16x16xf32>
    %26 = arith.subf %22, %25 : vector<16x16xf32>
    %27 = math.exp %26 : vector<16x16xf32>
    %cst_18 = arith.constant dense<0.000000e+00> : vector<16xf32>
    %28 = vector.multi_reduction <add>, %27, %cst_18 [1] : vector<16x16xf32> to vector<16xf32>
    %29 = vector.shape_cast %28 : vector<16xf32> to vector<16x1xf32>
    %30 = math.log %29 : vector<16x1xf32>
    %31 = vector.broadcast %30 : vector<16x1xf32> to vector<16x16xf32>
    %32 = arith.subf %26, %31 : vector<16x16xf32>
    %c0_19 = arith.constant 0 : index
    %c0_20 = arith.constant 0 : index
    %33 = vector.load %arg8[%c0_19, %c0_20] : memref<16x16xf32, #tpu.memory_space<vmem>>, vector<16x16xf32>
    tpu.vector_store %arg8[%c0_19, %c0_20], %32 {strides = array<i32>} : memref<16x16xf32, #tpu.memory_space<vmem>>, vector<16x16xf32>,
    return
  }
  func.func @transform_0(%arg0: i32) -> (i32, i32) {
    %c0_i32 = arith.constant 0 : i32
    %c0_i32_0 = arith.constant 0 : i32
    return %arg0, %c0_i32 : i32, i32
  }
  func.func @transform_1(%arg0: i32) -> (i32, i32) {
    %c0_i32 = arith.constant 0 : i32
    %c0_i32_0 = arith.constant 0 : i32
    %c0_i32_1 = arith.constant 0 : i32
    return %c0_i32, %c0_i32_0 : i32, i32
  }
  func.func @transform_2(%arg0: i32) -> (i32, i32) {
    %c0_i32 = arith.constant 0 : i32
    %c0_i32_0 = arith.constant 0 : i32
    %c0_i32_1 = arith.constant 0 : i32
    return %c0_i32, %c0_i32_0 : i32, i32
  }
  func.func @transform_3(%arg0: i32) -> (i32, i32) {
    %c0_i32 = arith.constant 0 : i32
    %c0_i32_0 = arith.constant 0 : i32
    %c0_i32_1 = arith.constant 0 : i32
    return %c0_i32, %c0_i32_0 : i32, i32
  }
  func.func @transform_4(%arg0: i32) -> (i32, i32) {
    %c0_i32 = arith.constant 0 : i32
    %c0_i32_0 = arith.constant 0 : i32
    %c0_i32_1 = arith.constant 0 : i32
    return %c0_i32, %c0_i32_0 : i32, i32
  }
  func.func @transform_5(%arg0: i32) -> (i32, i32) {
    %c0_i32 = arith.constant 0 : i32
    %c0_i32_0 = arith.constant 0 : i32
    %c0_i32_1 = arith.constant 0 : i32
    return %c0_i32, %c0_i32_0 : i32, i32
  }
  func.func @transform_6(%arg0: i32) -> (i32, i32) {
    %c0_i32 = arith.constant 0 : i32
    %c0_i32_0 = arith.constant 0 : i32
    %c0_i32_1 = arith.constant 0 : i32
    return %c0_i32, %c0_i32_0 : i32, i32
  }
  func.func @transform_7(%arg0: i32) -> (i32, i32) {
    %c0_i32 = arith.constant 0 : i32
    %c0_i32_0 = arith.constant 0 : i32
    return %arg0, %c0_i32 : i32, i32
  }
}

</mosaic_0001>

<bundles_post_ra>
// kernel: tpu_custom_call.1
= control target key start
LH: loop header
LB: loop body
LE: loop exit
PB: predicated region body
PF: predicated region fallthrough
CT: control target
= control target key end

     0   :  { %12 = vsyncpa [#allocation3], 0  ;;  %vm51_vm0 = vcmask 261120   ;;  %vm108_vm1 = vcmask 523264   ;;  %vm166_vm2 = vcmask 130048   ;;  %s387_s0 = inlined_call_operand.vmem [shape: f32[8,32], index: 0, kind: input, shape index: {}]   ;;  %s388_s1 = inlined_call_operand.vmem [shape: bf16[32,64], index: 1, kind: input, shape index: {}]   ;;  %s389_s2 = inlined_call_operand.vmem [shape: f32[1,64], index: 2, kind: input, shape index: {}]   ;;  %s390_s3 = inlined_call_operand.vmem [shape: bf16[64,32], index: 3, kind: input, shape index: {}]   ;;  %s391_s4 = inlined_call_operand.vmem [shape: f32[1,32], index: 4, kind: input, shape index: {}]   ;;  %s392_s5 = inlined_call_operand.vmem [shape: bf16[32,16], index: 5, kind: input, shape index: {}]   ;;  %s393_s6 = inlined_call_operand.vmem [shape: f32[1,16], index: 6, kind: input, shape index: {}]   ;;  %s394_s7 = inlined_call_operand.hbm [shape: f32[8,16], index: 7, kind: output, shape index: {}]  }
   0x1   :  { %v247_v0 = vld [vmem:[%s388_s1 + $0x8] sm:$0xff]  ;;  %v246_v1 = vld [vmem:[%s388_s1] sm:$0xff]  ;;  %v251_v5 = vld [vmem:[%s390_s3 + $0x18] sm:$0xff] }
   0x2   :  { %v28_v2 = vld [vmem:[%s387_s0] sm:$0xff]  ;;  %61 = vmatpush.bf16.msra.mxu0 %v247_v0  ;;  %v29_v3 = vld [vmem:[%s387_s0 + $0x8] sm:$0xff]  ;;  %116 = vmatpush.bf16.msra.mxu1 %v251_v5  ;;  %v250_v6 = vld [vmem:[%s390_s3 + $0x10] sm:$0xff] }
   0x3   :  { %v30_v4 = vpack.c.bf16 %v29_v3, %v28_v2  ;;  %v249_v7 = vld [vmem:[%s390_s3 + $0x8] sm:$0xff]  ;;  %v248_v8 = vld [vmem:[%s390_s3] sm:$0xff] }
   0x4   :  { %v257_v10 = vld [vmem:[%s389_s2] ss:$0 sm:$0xff]  ;;  %v253_v17 = vld [vmem:[%s392_s5 + $0x8] sm:$0xff] }
   0x5   :  { %158 = vmatpush.bf16.msra.mxu2 %v253_v17  ;;  %v252_v18 = vld [vmem:[%s392_s5] sm:$0xff] }
   0x6   :  { %62 = vmatpush.bf16.msra.mxu0 %v246_v1  ;;  %117 = vmatpush.bf16.msra.mxu1 %v250_v6  ;;  %v258_v20 = vld [vmem:[%s391_s4] ss:$0 sm:$0xff] }
   0x7   :  { %v259_v27 = vld [vmem:[%s393_s6] ss:$0 sm:$0xff] }
   0x9   :  { %219 = vmatmul.msk.bf16.vlgmr.msra.gmra.mxu0 %vm51_vm0, %v30_v4  ;;  %159 = vmatpush.bf16.msra.mxu2 %v252_v18 }
   0xa   :  { %118 = vmatpush.bf16.msra.mxu1 %v249_v7 }
   0xe   :  { %119 = vmatpush.bf16.msra.mxu1 %v248_v8 }
  0x86   :  { %v64_v9 = vpop.f32.mrf.mxu0 }
  0x87   :  { %v65_v11 = vadd.f32 %v257_v10, %v64_v9 }
  0x89   :  { %v69_v14 = vmax.f32 %v65_v11, 0.0 }
  0x8e   :  { %v66_v12 = vpop.f32.mrf.mxu0 }
  0x8f   :  { %v67_v13 = vadd.f32 %v257_v10, %v66_v12 }
  0x91   :  { %v70_v15 = vmax.f32 %v67_v13, 0.0 }
  0x93   :  { %v71_v16 = vpack.c.bf16 %v70_v15, %v69_v14 }
  0x95   :  { %236 = vmatmul.msk.bf16.vlgmr.msra.gmra.mxu1 %vm108_vm1, %v71_v16 }
 0x112   :  { %v121_v19 = vpop.f32.mrf.mxu1 }
 0x113   :  { %v122_v21 = vadd.f32 %v258_v20, %v121_v19 }
 0x115   :  { %v126_v24 = vmax.f32 %v122_v21, 0.0 }
 0x11a   :  { %v123_v22 = vpop.f32.mrf.mxu1 }
 0x11b   :  { %v124_v23 = vadd.f32 %v258_v20, %v123_v22 }
 0x11d   :  { %v127_v25 = vmax.f32 %v124_v23, 0.0 }
 0x11f   :  { %v128_v26 = vpack.c.bf16 %v127_v25, %v126_v24 }
 0x121   :  { %245 = vmatmul.msk.bf16.vlgmr.msra.gmra.mxu2 %vm51_vm0, %v128_v26 }
 0x1a4   :  { %v161_v28 = vpop.f32.mrf.mxu2 }
 0x1a5   :  { %v162_v29 = vadd.f32 %v259_v27, %v161_v28 }
 0x1a7   :  { %v167_v30 = vsel %vm166_vm2, %v162_v29, -inf }
 0x1a8   :  { %168 = vmax.xlane.f32.xlu0 %v167_v30 }
 0x1ac   :  { %v163_v31 = vpop.f32.mrf.mxu2 }
 0x1ad   :  { %v164_v32 = vadd.f32 %v259_v27, %v163_v31 }
 0x1af   :  { %v170_v33 = vsel %vm166_vm2, %v164_v32, -inf }
 0x1b0   :  { %171 = vmax.xlane.f32.xlu0 %v170_v33 }
 0x21b   :  { %v169_v34 = vpop.xlane.xlu0 %168 }
 0x21c   :  { %v173_v35 = vsub.f32 %v162_v29, %v169_v34 }
 0x21e   :  { %v175_v36 = vmul.f32 1.442695, %v173_v35 }
 0x220   :  { %260 = vpow2.f32 %v175_v36 }
 0x223   :  { %v172_v37 = vpop.xlane.xlu0 %171 }
 0x224   :  { %v174_v38 = vsub.f32 %v164_v32, %v172_v37 }
 0x226   :  { %v261_v39 = vpop.eup %260  ;;  %v177_v40 = vmul.f32 1.442695, %v174_v38 }
 0x227   :  { %v179_v41 = vsel %vm166_vm2, %v261_v39, 0.0 }
 0x228   :  { %262 = vpow2.f32 %v177_v40  ;;  %180 = vadd.xlane.f32.xlu1 %v179_v41 }
 0x22e   :  { %v263_v42 = vpop.eup %262 }
 0x22f   :  { %v182_v43 = vsel %vm166_vm2, %v263_v42, 0.0 }
 0x230   :  { %183 = vadd.xlane.f32.xlu1 %v182_v43 }
 0x29b   :  { %v181_v44 = vpop.xlane.xlu1 %180 }
 0x29c   :  { %264 = vlog2.f32 %v181_v44 }
 0x2a2   :  { %v265_v45 = vpop.eup %264 }
 0x2a3   :  { %v186_v46 = vmul.f32 0.6931472, %v265_v45  ;;  %v184_v47 = vpop.xlane.xlu1 %183 }
 0x2a4   :  { %266 = vlog2.f32 %v184_v47 }
 0x2a5   :  { %v189_v48 = vsub.f32 %v173_v35, %v186_v46 }
 0x2a7   :  { %191 = vst.msk [vmem:[#allocation2] sm:$0xff] %vm166_vm2, %v189_v48 }
 0x2aa   :  { %v267_v49 = vpop.eup %266 }
 0x2ab   :  { %v188_v50 = vmul.f32 0.6931472, %v267_v49 }
 0x2ad   :  { %v190_v51 = vsub.f32 %v174_v38, %v188_v50 }
 0x2af   :  { %192 = vst.msk [vmem:[#allocation2 + $0x8] sm:$0xff] %vm166_vm2, %v190_v51 }
 0x2b0   :  { %196 = vsyncadd [#allocation3], 128  ;;  %s199_s6 = sshll.u32 %s394_s7, 4  ;;  %s294_s23 = smov [#allocation2]   ;;  %s200_s6 = int_to_ptr.hbm [resolvable:$true] %s199_s6 }
 0x2b1   :  { %s197_s24 = sshll.u32 %s294_s23, 4  ;;  %s295_s25 = smov 128   ;;  %s198_s24 = int_to_ptr.vmem [resolvable:$true] %s197_s24 }
 0x2b2   :  { %s296_s26 = smov 8  }
 0x2b3   :  { %205 = dma.vmem_to_hbm [thread:$0]  %s198_s24, 128, %s200_s6, [#allocation3], %s295_s25, %s295_s25, %s296_s26  }
 0x2b4   :  { %292 = dma.done.wait [#allocation3], 256  }
 0x2b5   :  { %293 = vsyncadd [#allocation3], 4294967040 }
 0x2b6   :  { %210 = vsyncpa [#allocation3], 1 }

</bundles_post_ra>
